<compile_context>
chip_gen: v7x
topology: tpu7x:2x2x1
jax: 0.10.0
libtpu: 0.0.40
codegen_flags: <defaults>
</compile_context>

<pallas_src>
import functools

import jax
import jax.numpy as jnp
from jax.experimental import pallas as pl
from jax.experimental.pallas import tpu as pltpu


def _round_up(n, m):
    return ((n + m - 1) // m) * m


def highway_kernel(x_ref, wf_ref, bf_ref, o_ref):
    """One row tile of tokens.

    x_ref : (TM, D)  float32   pipelined row tile
    wf_ref: (D, 2D)  bfloat16  fused [W1^T | W2^T], resident in VMEM
    bf_ref: (1, 2D)  float32   fused [b1   | b2  ], resident in VMEM
    o_ref : (TM, D)  float32
    """
    d = x_ref.shape[-1]
    x = x_ref[...]                                              # f32 residual path
    # Single fused MXU matmul: bf16 operands, f32 accumulation.
    h = jnp.dot(x.astype(jnp.bfloat16), wf_ref[...],
                preferred_element_type=jnp.float32) + bf_ref[...]   # (TM, 2D) f32
    x1 = h[:, :d]
    x2 = h[:, d:]
    g = jax.nn.sigmoid(x2)                                      # EUP exp, f32
    o_ref[...] = (g * jnp.maximum(x1, 0.0) + (1.0 - g) * x).astype(o_ref.dtype)


@functools.partial(jax.jit, static_argnames=("tm",))
def highway_pallas(x, wf, bf, *, tm=256):
    """x: (B, T, D) f32.  wf: (D, 2D) bf16 fused weight.  bf: (1, 2D) f32 fused bias."""
    B, T, D = x.shape
    M = B * T
    x2d = x.reshape(M, D)

    # ---- row-tile sizing (multiple of 8 sublanes, capped by padded row count) ----
    tm_eff = max(8, min(tm, _round_up(M, 8)))
    tm_eff = _round_up(tm_eff, 8)

    # ---- explicit VMEM budget (conservative: fits v7x / 32 MiB scoped default) ----
    # weights+bias single-buffered resident; x and out double-buffered by pipeline.
    budget = 24 * 1024 * 1024

    def footprint(t):
        w_bytes = wf.size * wf.dtype.itemsize + bf.size * bf.dtype.itemsize
        io_bytes = 2 * 2 * t * D * x.dtype.itemsize
        return w_bytes + io_bytes

    while tm_eff > 8 and footprint(tm_eff) > budget:
        tm_eff = max(8, _round_up(tm_eff // 2, 8))

    # ---- pad rows to a whole number of tiles (no divisibility assert) ----
    Mp = _round_up(M, tm_eff)
    if Mp != M:
        x2d = jnp.pad(x2d, ((0, Mp - M), (0, 0)))

    grid = (Mp // tm_eff,)
    flops = 4 * Mp * D * D                       # one (Mp, D) x (D, 2D) matmul
    bytes_accessed = (2 * Mp * D * x.dtype.itemsize
                      + wf.size * wf.dtype.itemsize
                      + bf.size * bf.dtype.itemsize)

    out = pl.pallas_call(
        highway_kernel,
        out_shape=jax.ShapeDtypeStruct((Mp, D), x.dtype),
        grid_spec=pltpu.PrefetchScalarGridSpec(
            num_scalar_prefetch=0,
            grid=grid,
            in_specs=[
                pl.BlockSpec((tm_eff, D), lambda i: (i, 0)),          # x row tile
                pl.BlockSpec(memory_space=pltpu.MemorySpace.VMEM),    # fused W (resident)
                pl.BlockSpec(memory_space=pltpu.MemorySpace.VMEM),    # fused b (resident)
            ],
            out_specs=pl.BlockSpec((tm_eff, D), lambda i: (i, 0)),
        ),
        compiler_params=pltpu.CompilerParams(
            dimension_semantics=("parallel",)),
        cost_estimate=pl.CostEstimate(
            flops=flops, transcendentals=Mp * D, bytes_accessed=bytes_accessed),
    )(x2d, wf, bf)

    return out[:M].reshape(B, T, D)


def init_highway_params(key, size):
    """nn.Linear-style init (uniform +-1/sqrt(size)); W1.bias filled with 0.0."""
    k1, k2, k3 = jax.random.split(key, 3)
    bound = 1.0 / (size ** 0.5)
    w1 = jax.random.uniform(k1, (size, size), jnp.float32, -bound, bound)  # (out, in)
    w2 = jax.random.uniform(k2, (size, size), jnp.float32, -bound, bound)
    b1 = jnp.zeros((1, size), jnp.float32)                                  # fill_(0.0)
    b2 = jax.random.uniform(k3, (1, size), jnp.float32, -bound, bound)
    return w1, b1, w2, b2


def fuse_params(w1, b1, w2, b2):
    """Pre-transpose and fuse both linears: x @ [W1^T | W2^T] + [b1 | b2]."""
    wf = jnp.concatenate([w1.T, w2.T], axis=1).astype(jnp.bfloat16)  # (D, 2D) bf16
    bf = jnp.concatenate([b1, b2], axis=1).astype(jnp.float32)       # (1, 2D) f32
    return wf, bf


def highway_ref(x, w1, b1, w2, b2):
    x1 = x @ w1.T + b1
    x2 = x @ w2.T + b2
    g = jax.nn.sigmoid(x2)
    return g * jnp.maximum(x1, 0.0) + (1.0 - g) * x


if __name__ == "__main__":
    key = jax.random.PRNGKey(0)
    # Tacotron highway size is 128 -> lane-dense feature dim.
    B, T, D = 2, 16, 128
    kx, kp = jax.random.split(key)
    x = jax.random.normal(kx, (B, T, D), jnp.float32)
    w1, b1, w2, b2 = init_highway_params(kp, D)
    wf, bf = fuse_params(w1, b1, w2, b2)

    y = highway_pallas(x, wf, bf, tm=256)
    y = jax.block_until_ready(y)

    y_ref = highway_ref(x, w1, b1, w2, b2)
    assert y.shape == (B, T, D)
    # bf16 MXU operands with f32 accumulation -> loose tolerance vs the pure-f32 ref.
    assert jnp.allclose(y, y_ref, atol=5e-2, rtol=5e-2), "mismatch vs reference"
    print("KERNEL_OK")
</pallas_src>

<mosaic_0001>
module attributes {stable_mosaic.version = 11 : i64} {
  func.func @highway_kernel(%arg0: i32, %arg1: memref<32x128xf32, #tpu.memory_space<vmem>>, %arg2: memref<128x256xbf16, #tpu.memory_space<vmem>>, %arg3: memref<1x256xf32, #tpu.memory_space<vmem>>, %arg4: memref<32x128xf32, #tpu.memory_space<vmem>>) attributes {dimension_semantics = [#tpu.dimension_semantics<parallel>], iteration_bounds = array<i64: 1>, scalar_prefetch = 0 : i64, scratch_operands = 0 : i64, tpu.core_type = #tpu.core_type<tc>, window_params = [{transform_indices = @transform_0, window_bounds = array<i64: 32, 128>}, {pipeline_mode = #tpu.pipeline_mode<synchronous>, transform_indices = @transform_1, window_bounds = array<i64: 128, 256>}, {pipeline_mode = #tpu.pipeline_mode<synchronous>, transform_indices = @transform_2, window_bounds = array<i64: 1, 256>}, {transform_indices = @transform_3, window_bounds = array<i64: 32, 128>}]} {
    %c0 = arith.constant 0 : index
    %c0_0 = arith.constant 0 : index
    %0 = vector.load %arg1[%c0, %c0_0] : memref<32x128xf32, #tpu.memory_space<vmem>>, vector<32x128xf32>
    %1 = arith.truncf %0 : vector<32x128xf32> to vector<32x128xbf16>
    %c0_1 = arith.constant 0 : index
    %c0_2 = arith.constant 0 : index
    %2 = vector.load %arg2[%c0_1, %c0_2] : memref<128x256xbf16, #tpu.memory_space<vmem>>, vector<128x256xbf16>
    %cst = arith.constant dense<0.000000e+00> : vector<32x256xf32>
    %3 = tpu.matmul %1, %2, %cst {dimension_numbers = #tpu.dot_dimension_numbers<[1], [0], [0], [1], [0, 0, 1, 1], [], []>} : vector<32x128xbf16>, vector<128x256xbf16>, vector<32x256xf32> -> vector<32x256xf32>
    %c0_3 = arith.constant 0 : index
    %c0_4 = arith.constant 0 : index
    %4 = vector.load %arg3[%c0_3, %c0_4] : memref<1x256xf32, #tpu.memory_space<vmem>>, vector<1x256xf32>
    %5 = vector.broadcast %4 : vector<1x256xf32> to vector<32x256xf32>
    %6 = arith.addf %3, %5 : vector<32x256xf32>
    %7 = vector.extract_strided_slice %6 {offsets = [0, 0], sizes = [32, 128], strides = [1, 1]} : vector<32x256xf32> to vector<32x128xf32>
    %8 = vector.extract_strided_slice %6 {offsets = [0, 128], sizes = [32, 128], strides = [1, 1]} : vector<32x256xf32> to vector<32x128xf32>
    %9 = arith.negf %8 : vector<32x128xf32>
    %10 = math.exp %9 : vector<32x128xf32>
    %cst_5 = arith.constant 1.000000e+00 : f32
    %11 = vector.broadcast %cst_5 : f32 to vector<32x128xf32>
    %12 = arith.addf %11, %10 : vector<32x128xf32>
    %13 = arith.divf %11, %12 : vector<32x128xf32>
    %cst_6 = arith.constant 0.000000e+00 : f32
    %14 = vector.broadcast %cst_6 : f32 to vector<32x128xf32>
    %15 = arith.maximumf %7, %14 : vector<32x128xf32>
    %16 = arith.mulf %13, %15 : vector<32x128xf32>
    %cst_7 = arith.constant 1.000000e+00 : f32
    %17 = vector.broadcast %cst_7 : f32 to vector<32x128xf32>
    %18 = arith.subf %17, %13 : vector<32x128xf32>
    %19 = arith.mulf %18, %0 : vector<32x128xf32>
    %20 = arith.addf %16, %19 : vector<32x128xf32>
    %c0_8 = arith.constant 0 : index
    %c0_9 = arith.constant 0 : index
    %21 = vector.load %arg4[%c0_8, %c0_9] : memref<32x128xf32, #tpu.memory_space<vmem>>, vector<32x128xf32>
    tpu.vector_store %arg4[%c0_8, %c0_9], %20 {strides = array<i32>} : memref<32x128xf32, #tpu.memory_space<vmem>>, vector<32x128xf32>,
    return
  }
  func.func @transform_0(%arg0: i32) -> (i32, i32) {
    %c0_i32 = arith.constant 0 : i32
    %c0_i32_0 = arith.constant 0 : i32
    return %arg0, %c0_i32 : i32, i32
  }
  func.func @transform_1(%arg0: i32) -> (i32, i32) {
    %c0_i32 = arith.constant 0 : i32
    %c0_i32_0 = arith.constant 0 : i32
    %c0_i32_1 = arith.constant 0 : i32
    return %c0_i32, %c0_i32_0 : i32, i32
  }
  func.func @transform_2(%arg0: i32) -> (i32, i32) {
    %c0_i32 = arith.constant 0 : i32
    %c0_i32_0 = arith.constant 0 : i32
    %c0_i32_1 = arith.constant 0 : i32
    return %c0_i32, %c0_i32_0 : i32, i32
  }
  func.func @transform_3(%arg0: i32) -> (i32, i32) {
    %c0_i32 = arith.constant 0 : i32
    %c0_i32_0 = arith.constant 0 : i32
    return %arg0, %c0_i32 : i32, i32
  }
}

</mosaic_0001>

<bundles_post_ra>
// kernel: highway_pallas.1
= control target key start
LH: loop header
LB: loop body
LE: loop exit
PB: predicated region body
PF: predicated region fallthrough
CT: control target
= control target key end

     0   :  { %8 = vsyncpa [#allocation3], 0  ;;  %s521_s0 = inlined_call_operand.hbm [shape: f32[32,128], index: 0, kind: input, shape index: {}]   ;;  %s522_s1 = inlined_call_operand.hbm [shape: bf16[128,256], index: 1, kind: input, shape index: {}]   ;;  %s523_s2 = inlined_call_operand.vmem [shape: f32[1,256], index: 2, kind: input, shape index: {}]   ;;  %s524_s3 = inlined_call_operand.hbm [shape: f32[32,128], index: 3, kind: output, shape index: {}]  }
   0x1   :  { %9 = vsyncpa [#allocation6], 0 }
   0x2   :  { %10 = vsyncpa [#allocation4], 0  ;;  %s431_s12 = smov [#allocation2]   ;;  %s359_s16 = scalar_lea.hbm %s521_s0, 512 }
   0x3   :  { %s16_s13 = sshll.u32 %s431_s12, 4  ;;  %p360_p0 = scmp.ne.s32.totalorder %s521_s0, %s359_s16  ;;  %s17_s13 = int_to_ptr.vmem [resolvable:$true] %s16_s13 }
   0x4   :  { %p363_p1 = scmp.lt.u32.totalorder %s359_s16, %s521_s0 }
   0x6   :  { %p365_p2 = pnand %p363_p1, %p360_p0 }
   0x8   :  { %368 = shalt.err (!%p365_p2)
}
   0x9   :  { %s369_s21 = scalar_lea.vmem %s17_s13, 512  ;;  %p374_p4 = scmp.lt.s32.totalorder %s17_s13, %s17_s13 }
   0xa   :  { %p370_p3 = scmp.ne.s32.totalorder %s17_s13, %s369_s21  ;;  %p375_p5 = scmp.lt.s32.totalorder %s369_s21, %s369_s21 }
   0xc   :  { %p376_p6 = por %p375_p5, %p374_p4 }
   0xe   :  { %p377_p7 = pnand %p376_p6, %p370_p3 }
  0x10   :  { %380 = shalt.err (!%p377_p7)
}
  0x11   :  { %s432_s22 = smov 128   ;;  %s433_s23 = smov 8  }
  0x12   :  { %22 = dma.hbm_to_vmem [thread:$0]  %s521_s0, 512, %s17_s13, [#allocation3], %s432_s22, %s432_s22, %s433_s23  }
  0x13   :  { %s434_s26 = smov [#allocation5]   ;;  %s381_s30 = scalar_lea.hbm %s522_s1, 2048 }
  0x14   :  { %s28_s27 = sshll.u32 %s434_s26, 4  ;;  %p382_p8 = scmp.ne.s32.totalorder %s522_s1, %s381_s30  ;;  %s29_s27 = int_to_ptr.vmem [resolvable:$true] %s28_s27 }
  0x15   :  { %p385_p9 = scmp.lt.u32.totalorder %s381_s30, %s522_s1 }
  0x17   :  { %p387_p10 = pnand %p385_p9, %p382_p8 }
  0x19   :  { %390 = shalt.err (!%p387_p10)
}
  0x1a   :  { %s391_s8 = scalar_lea.vmem %s29_s27, 2048  ;;  %p396_p12 = scmp.lt.s32.totalorder %s29_s27, %s29_s27 }
  0x1b   :  { %p392_p11 = scmp.ne.s32.totalorder %s29_s27, %s391_s8  ;;  %p397_p13 = scmp.lt.s32.totalorder %s391_s8, %s391_s8 }
  0x1d   :  { %p398_p0 = por %p397_p13, %p396_p12 }
  0x1f   :  { %p399_p1 = pnand %p398_p0, %p392_p11 }
  0x21   :  { %402 = shalt.err (!%p399_p1)
}
  0x22   :  { %34 = dma.hbm_to_vmem [thread:$0]  %s522_s1, 2048, %s29_s27, [#allocation6], %s432_s22, %s432_s22, %s433_s23  }
  0x23   :  { %425 = dma.done.wait [#allocation3], 512  }
  0x24   :  { %426 = vsyncadd [#allocation3], 4294966784 }
  0x25   :  { %427 = dma.done.wait [#allocation6], 2048  }
  0x26   :  { %428 = vsyncadd [#allocation6], 4294965248  ;;  %v435_v0 = vmov 0   ;;  %v319_v1 = vld [vmem:[#allocation5 + $0x4] ss:$8 sps:$4 sm:$0xff]   ;;  %v491_v19 = vld [vmem:[#allocation2 + $0x10] sm:$0xff]  ;;  %v68_v23 = vlaneseq }
  0x27   :  { %190 = vmatprep.mubr.bf16.mxu0 %v435_v0  ;;  %200 = vmatprep.mubr.bf16.mxu1 %v435_v0  ;;  %v321_v2 = vld [vmem:[#allocation5] ss:$8 sps:$4 sm:$0xff]   ;;  %v322_v3 = vld [vmem:[#allocation5 + $0x14] ss:$8 sps:$4 sm:$0xff]   ;;  %v324_v4 = vld [vmem:[#allocation5 + $0x10] ss:$8 sps:$4 sm:$0xff]  }
  0x28   :  { %158 = vmatprep.subr.bf16.mxu0 %v319_v1  ;;  %297 = vmatprep.subr.bf16.mxu1 %v319_v1  ;;  %v325_v5 = vld [vmem:[#allocation5 + $0x24] ss:$8 sps:$4 sm:$0xff]   ;;  %v327_v6 = vld [vmem:[#allocation5 + $0x20] ss:$8 sps:$4 sm:$0xff]   ;;  %v328_v7 = vld [vmem:[#allocation5 + $0x34] ss:$8 sps:$4 sm:$0xff]  }
  0x29   :  { %159 = vmatpush1.bf16.msra.mxu0 %v321_v2  ;;  %305 = vmatpush1.bf16.msra.mxu1 %v321_v2  ;;  %v330_v8 = vld [vmem:[#allocation5 + $0x30] ss:$8 sps:$4 sm:$0xff]   ;;  %v331_v9 = vld [vmem:[#allocation5 + $0x44] ss:$8 sps:$4 sm:$0xff]   ;;  %v333_v10 = vld [vmem:[#allocation5 + $0x40] ss:$8 sps:$4 sm:$0xff]  }
  0x2a   :  { %160 = vmatprep.subr.bf16.mxu0 %v322_v3  ;;  %298 = vmatprep.subr.bf16.mxu1 %v322_v3  ;;  %v334_v11 = vld [vmem:[#allocation5 + $0x54] ss:$8 sps:$4 sm:$0xff]   ;;  %v336_v12 = vld [vmem:[#allocation5 + $0x50] ss:$8 sps:$4 sm:$0xff]   ;;  %v337_v13 = vld [vmem:[#allocation5 + $0x64] ss:$8 sps:$4 sm:$0xff]  }
  0x2b   :  { %v339_v14 = vld [vmem:[#allocation5 + $0x60] ss:$8 sps:$4 sm:$0xff]   ;;  %v340_v15 = vld [vmem:[#allocation5 + $0x74] ss:$8 sps:$4 sm:$0xff]   ;;  %v342_v16 = vld [vmem:[#allocation5 + $0x70] ss:$8 sps:$4 sm:$0xff]  }
  0x2c   :  { %v487_v17 = vld [vmem:[#allocation2] sm:$0xff]  ;;  %v489_v18 = vld [vmem:[#allocation2 + $0x8] sm:$0xff]  ;;  %v493_v20 = vld [vmem:[#allocation2 + $0x18] sm:$0xff]  ;;  %v69_v24 = vshrl.u32 %v68_v23, 7 }
  0x2d   :  { %161 = vmatpush1.bf16.msra.mxu0 %v324_v4  ;;  %306 = vmatpush1.bf16.msra.mxu1 %v324_v4  ;;  %v48_v21 = vpack.c.bf16 %v489_v18, %v487_v17  ;;  %v49_v22 = vpack.c.bf16 %v493_v20, %v491_v19  ;;  %v66_v26 = vld [vmem:[%s523_s2] sm:$0x3]  ;;  %s436_s2 = smov [#allocation7]  }
  0x2e   :  { %162 = vmatprep.subr.bf16.mxu0 %v325_v5  ;;  %299 = vmatprep.subr.bf16.mxu1 %v325_v5  ;;  %v74_v25 = vsub.s32 1, %v69_v24  ;;  %v70_v45 = vsub.s32 0, %v69_v24  ;;  %s264_s11 = sshll.u32 %s436_s2, 4  ;;  %s265_s11 = int_to_ptr.vmem [resolvable:$true] %s264_s11 }
  0x2f   :  { %s403_s12 = scalar_lea.vmem %s265_s11, 512  ;;  %p408_p3 = scmp.lt.s32.totalorder %s265_s11, %s265_s11 }
  0x30   :  { %v75_v27 = vrot.slane %v66_v26, %v74_v25  ;;  %v71_v52 = vrot.slane %v66_v26, %v70_v45  ;;  %p404_p2 = scmp.ne.s32.totalorder %s265_s11, %s403_s12  ;;  %p409_p4 = scmp.lt.s32.totalorder %s403_s12, %s403_s12 }
  0x31   :  { %163 = vmatpush1.bf16.msra.mxu0 %v327_v6  ;;  %307 = vmatpush1.bf16.msra.mxu1 %v327_v6 }
  0x32   :  { %164 = vmatprep.subr.bf16.mxu0 %v328_v7  ;;  %300 = vmatprep.subr.bf16.mxu1 %v328_v7  ;;  %p410_p5 = por %p409_p4, %p408_p3 }
  0x34   :  { %p411_p6 = pnand %p410_p5, %p404_p2 }
  0x35   :  { %165 = vmatpush1.bf16.msra.mxu0 %v330_v8  ;;  %308 = vmatpush1.bf16.msra.mxu1 %v330_v8 }
  0x36   :  { %166 = vmatprep.subr.bf16.mxu0 %v331_v9  ;;  %301 = vmatprep.subr.bf16.mxu1 %v331_v9 }
  0x39   :  { %167 = vmatpush1.bf16.msra.mxu0 %v333_v10  ;;  %309 = vmatpush1.bf16.msra.mxu1 %v333_v10 }
  0x3a   :  { %168 = vmatprep.subr.bf16.mxu0 %v334_v11  ;;  %302 = vmatprep.subr.bf16.mxu1 %v334_v11 }
  0x3d   :  { %169 = vmatpush1.bf16.msra.mxu0 %v336_v12  ;;  %310 = vmatpush1.bf16.msra.mxu1 %v336_v12 }
  0x3e   :  { %170 = vmatprep.subr.bf16.mxu0 %v337_v13  ;;  %303 = vmatprep.subr.bf16.mxu1 %v337_v13 }
  0x41   :  { %171 = vmatpush1.bf16.msra.mxu0 %v339_v14  ;;  %311 = vmatpush1.bf16.msra.mxu1 %v339_v14 }
  0x42   :  { %172 = vmatprep.subr.bf16.mxu0 %v340_v15  ;;  %304 = vmatprep.subr.bf16.mxu1 %v340_v15 }
  0x45   :  { %173 = vmatpush1.bf16.msra.mxu0 %v342_v16  ;;  %312 = vmatpush1.bf16.msra.mxu1 %v342_v16 }
  0x48   :  { %191 = vmatmul.mubr.bf16.vlgmr.msra.gmra.mrb[0].mxu0 %v48_v21  ;;  %201 = vmatmul.mubr.bf16.vlgmr.msra.gmra.mrb[0].mxu1 %v49_v22 }
 0x11b   :  { %v192_v28 = vpop.f32.mrb[0].mxu0  ;;  %v202_v29 = vpop.f32.mrb[0].mxu1 }
 0x11c   :  { %v194_v30 = vpop.f32.mrb[1].mxu0  ;;  %v204_v31 = vpop.f32.mrb[1].mxu1  ;;  %v193_v54 = vadd.f32 %v192_v28, %v71_v52  ;;  %v203_v55 = vadd.f32 %v202_v29, %v71_v52 }
 0x11d   :  { %v195_v32 = vadd.f32 %v194_v30, %v75_v27  ;;  %v205_v33 = vadd.f32 %v204_v31, %v75_v27  ;;  %v196_v34 = vpop.f32.mrb[2].mxu0  ;;  %v206_v35 = vpop.f32.mrb[2].mxu1 }
 0x11e   :  { %v198_v36 = vpop.f32.mrb[3].mxu0  ;;  %v208_v37 = vpop.f32.mrb[3].mxu1  ;;  %v197_v56 = vadd.f32 %v196_v34, %v71_v52  ;;  %v207_v57 = vadd.f32 %v206_v35, %v71_v52  ;;  %v235_v58 = vmax.f32 %v193_v54, 0.0  ;;  %v237_v60 = vmax.f32 %v203_v55, 0.0 }
 0x11f   :  { %v293_v38 = vmul.f32 -1.442695, %v195_v32  ;;  %v295_v39 = vmul.f32 -1.442695, %v205_v33  ;;  %v199_v40 = vadd.f32 %v198_v36, %v75_v27  ;;  %v209_v41 = vadd.f32 %v208_v37, %v75_v27 }
 0x120   :  { %v236_v62 = vmax.f32 %v197_v56, 0.0  ;;  %v238_v2 = vmax.f32 %v207_v57, 0.0 }
 0x121   :  { %343 = vpow2.f32 %v293_v38  ;;  %v294_v42 = vmul.f32 -1.442695, %v199_v40  ;;  %v296_v43 = vmul.f32 -1.442695, %v209_v41 }
 0x122   :  { %345 = vpow2.f32 %v295_v39 }
 0x123   :  { %347 = vpow2.f32 %v294_v42 }
 0x124   :  { %349 = vpow2.f32 %v296_v43 }
 0x12b   :  { %v344_v44 = vpop.eup %343 }
 0x12c   :  { %v346_v46 = vpop.eup %345  ;;  %v223_v47 = vadd.f32 1.0, %v344_v44 }
 0x12d   :  { %v348_v48 = vpop.eup %347  ;;  %v225_v49 = vadd.f32 1.0, %v346_v46 }
 0x12e   :  { %v350_v50 = vpop.eup %349  ;;  %351 = vrcp.f32 %v223_v47  ;;  %v224_v51 = vadd.f32 1.0, %v348_v48 }
 0x12f   :  { %353 = vrcp.f32 %v225_v49  ;;  %v226_v53 = vadd.f32 1.0, %v350_v50 }
 0x130   :  { %355 = vrcp.f32 %v224_v51 }
 0x131   :  { %357 = vrcp.f32 %v226_v53 }
 0x138   :  { %v352_v59 = vpop.eup %351 }
 0x139   :  { %v354_v61 = vpop.eup %353  ;;  %v239_v63 = vmul.f32 %v352_v59, %v235_v58  ;;  %v243_v0 = vsub.f32 1.0, %v352_v59 }
 0x13a   :  { %v356_v1 = vpop.eup %355  ;;  %v241_v3 = vmul.f32 %v354_v61, %v237_v60  ;;  %v245_v4 = vsub.f32 1.0, %v354_v61 }
 0x13b   :  { %v358_v5 = vpop.eup %357  ;;  %v240_v6 = vmul.f32 %v356_v1, %v236_v62  ;;  %v244_v7 = vsub.f32 1.0, %v356_v1  ;;  %v247_v8 = vmul.f32 %v243_v0, %v487_v17 }
 0x13c   :  { %v242_v9 = vmul.f32 %v358_v5, %v238_v2  ;;  %v246_v10 = vsub.f32 1.0, %v358_v5  ;;  %v249_v11 = vmul.f32 %v245_v4, %v491_v19 }
 0x13d   :  { %v248_v12 = vmul.f32 %v244_v7, %v489_v18  ;;  %v251_v13 = vadd.f32 %v247_v8, %v239_v63 }
 0x13e   :  { %v250_v14 = vmul.f32 %v246_v10, %v493_v20  ;;  %v253_v15 = vadd.f32 %v249_v11, %v241_v3 }
 0x13f   :  { %v252_v16 = vadd.f32 %v248_v12, %v240_v6  ;;  %255 = vst [vmem:[#allocation7] sm:$0xff] %v251_v13 }
 0x140   :  { %v254_v21 = vadd.f32 %v250_v14, %v242_v9  ;;  %257 = vst [vmem:[#allocation7 + $0x10] sm:$0xff] %v253_v15 }
 0x141   :  { %256 = vst [vmem:[#allocation7 + $0x8] sm:$0xff] %v252_v16 }
 0x142   :  { %258 = vst [vmem:[#allocation7 + $0x18] sm:$0xff] %v254_v21 }
 0x143   :  { %414 = shalt.err (!%p411_p6)
}
 0x144   :  { %s415_s15 = scalar_lea.hbm %s524_s3, 512 }
 0x145   :  { %p416_p7 = scmp.ne.s32.totalorder %s524_s3, %s415_s15  ;;  %p419_p8 = scmp.lt.u32.totalorder %s415_s15, %s524_s3 }
 0x147   :  { %p421_p9 = pnand %p419_p8, %p416_p7 }
 0x149   :  { %424 = shalt.err (!%p421_p9)
}
 0x14a   :  { %270 = dma.vmem_to_hbm [thread:$0]  %s265_s11, 512, %s524_s3, [#allocation4], %s432_s22, %s432_s22, %s433_s23  }
 0x14b   :  { %429 = dma.done.wait [#allocation4], 512  }
 0x14c   :  { %430 = vsyncadd [#allocation4], 4294966784 }
 0x14d   :  { %274 = vsyncpa [#allocation3], 1 }
 0x14e   :  { %275 = vsyncpa [#allocation6], 1 }
 0x14f   :  { %276 = vsyncpa [#allocation4], 1 }

</bundles_post_ra>
